<compile_context>
chip_gen: v7x
topology: tpu7x:2x2x1
jax: 0.10.0
libtpu: 0.0.40
codegen_flags: <defaults>
</compile_context>

<pallas_src>
import numpy as np
import jax
import jax.numpy as jnp
from jax.experimental import pallas as pl
from jax.experimental.pallas import tpu as pltpu


def _round_up(n, m):
    return ((n + m - 1) // m) * m


def _make_kernel(num_fields, embed_dim, fields_per_dot, mm_dtype):
    """Per-tile kernel.

    idx_ref:   (TB, F)      int32    global (offset-folded) indices
    table_ref: (V_pad, D)   f32/bf16 full vocab-padded table (VMEM resident)
    out_ref:   (TB, F * D)  f32      lane-dense output block
    """

    def kernel(idx_ref, table_ref, out_ref):
        idx = idx_ref[...]                                     # (TB, F)
        table = table_ref[...]                                 # (V_pad, D)
        tb = idx.shape[0]
        v_pad = table.shape[0]

        # One iota, reused for every field (hoisted broadcast).
        col = jax.lax.broadcasted_iota(jnp.int32, (tb, v_pad), 1)

        for f0 in range(0, num_fields, fields_per_dot):
            nf = min(fields_per_dot, num_fields - f0)
            # Field-major one-hots for this group: (nf, TB, V_pad).
            # 0/1 is exact in bf16, so the cast is lossless.
            parts = [(idx[:, f0 + j:f0 + j + 1] == col).astype(mm_dtype)
                     for j in range(nf)]
            onehot = jnp.stack(parts, axis=0)
            # ONE MXU call for the whole group: the RHS (table) is pushed into
            # the weight registers once, not once per field.
            rows = jnp.dot(onehot.reshape(nf * tb, v_pad), table,
                           preferred_element_type=jnp.float32)  # (nf*TB, D)
            rows = rows.reshape(nf, tb, embed_dim)
            # Lane-dense group store (group width nf*D is a multiple of 128
            # whenever 128 % D == 0 -> unmasked vst's).
            group = jnp.concatenate([rows[j] for j in range(nf)], axis=-1)
            out_ref[:, f0 * embed_dim:(f0 + nf) * embed_dim] = group

    return kernel


def features_embedding(x, offsets, table, *, tile_b=512, table_dtype=None):
    """x: (B, F) int, offsets: (F,) or (1, F) int, table: (V, D) float.
    Returns (B, F, D) float32 -- matches torch FeaturesEmbedding.forward.

    table_dtype=jnp.bfloat16 runs the lookup with a bf16 table (MXU-native,
    half the VMEM/HBM); each output row is then the bf16-rounded embedding.
    """
    B, F = x.shape
    V, D = table.shape

    # Fold the per-field offsets into the indices (one fused XLA add); removes
    # an int32 input stream and a per-tile VPU add from the kernel.
    idx = x.astype(jnp.int32) + jnp.reshape(offsets, (1, F)).astype(jnp.int32)

    if table_dtype is not None and table.dtype != jnp.dtype(table_dtype):
        table = table.astype(table_dtype)

    # Pad vocab to a lane multiple for an aligned one-hot / clean MXU K dim.
    v_pad = _round_up(V, 128)
    if v_pad != V:
        table = jnp.pad(table, ((0, v_pad - V), (0, 0)))

    # Batch tiling: large tiles amortize per-step overhead and keep the
    # writeback DMA near roofline, but keep >= 2 grid steps when the batch
    # allows it so v7x can shard the "parallel" axis across both TensorCores.
    tile_b = max(8, min(int(tile_b), _round_up(B, 8)))
    tile_b = min(tile_b, max(8, _round_up(-(-B // 2), 8)))
    b_pad = _round_up(B, tile_b)
    if b_pad != B:
        # Padded rows gather row 0 and are sliced off below.
        idx = jnp.pad(idx, ((0, b_pad - B), (0, 0)))

    # How many fields share one MXU call: all of them while the stacked
    # one-hot intermediate stays small, otherwise one 128-lane output group
    # (128 // D fields) at a time.
    mm_item = jnp.dtype(table.dtype).itemsize
    if F * tile_b * v_pad * mm_item <= (8 << 20):
        fields_per_dot = F
    elif D < 128 and 128 % D == 0:
        fields_per_dot = max(1, 128 // D)
    else:
        fields_per_dot = 1

    kernel = _make_kernel(F, D, fields_per_dot, table.dtype)

    # Derived VMEM budget: table + double-buffered idx/out blocks + one-hot /
    # result intermediates + slack, clamped to ~5/8 of physical VMEM
    # (<= 40 MiB on v7x's 64 MiB).
    tbl_bytes = v_pad * D * mm_item
    idx_bytes = tile_b * F * 4
    out_bytes = tile_b * F * D * 4
    onehot_bytes = fields_per_dot * tile_b * v_pad * mm_item
    rows_bytes = fields_per_dot * tile_b * D * 4
    needed = (2 * (tbl_bytes + idx_bytes + out_bytes)
              + onehot_bytes + rows_bytes + (4 << 20))
    try:
        vmem_cap = int(pltpu.get_tpu_info().vmem_capacity_bytes)
    except Exception:
        vmem_cap = 64 << 20                      # v7x worst case
    vmem_limit = int(min(max(needed, 16 << 20), (vmem_cap * 5) // 8))

    cost = pl.CostEstimate(
        flops=2 * b_pad * F * v_pad * D,
        transcendentals=0,
        bytes_accessed=tbl_bytes + b_pad * F * 4 + b_pad * F * D * 4,
    )

    def run(single_buffer_table):
        table_kwargs = {}
        if single_buffer_table:
            # The table block index is constant, so it is fetched once; a
            # single buffer halves its VMEM footprint vs. default pipelining.
            table_kwargs["pipeline_mode"] = pl.Buffered(1)
        grid_spec = pltpu.PrefetchScalarGridSpec(
            num_scalar_prefetch=0,
            grid=(b_pad // tile_b,),
            in_specs=[
                pl.BlockSpec((tile_b, F), lambda i: (i, 0)),      # idx tile
                pl.BlockSpec((v_pad, D), lambda i: (0, 0),        # full table
                             **table_kwargs),
            ],
            out_specs=pl.BlockSpec((tile_b, F * D), lambda i: (i, 0)),
        )
        return pl.pallas_call(
            kernel,
            out_shape=jax.ShapeDtypeStruct((b_pad, F * D), jnp.float32),
            grid_spec=grid_spec,
            compiler_params=pltpu.CompilerParams(
                dimension_semantics=("parallel",),    # megacore shard on v7x
                vmem_limit_bytes=vmem_limit),
            cost_estimate=cost,
        )(idx, table)

    try:
        out = run(True)
    except Exception:
        # jax version without BlockSpec(pipeline_mode=pl.Buffered(1)) support:
        # fall back to default (double-buffered) pipelining of the table.
        out = run(False)

    return out[:B].reshape(B, F, D)


if __name__ == "__main__":
    # ---- module config (synthetic, deterministic) ----
    field_dims = np.array([10, 20, 15, 5, 7, 12, 9, 3], dtype=np.int64)
    num_fields = len(field_dims)            # 8
    embed_dim = 32
    vocab = int(field_dims.sum())           # 81
    batch = 4

    key = jax.random.PRNGKey(0)
    k_w, k_x = jax.random.split(key)

    # torch.nn.init.xavier_uniform_ on (vocab, embed_dim)
    bound = float(np.sqrt(6.0 / (vocab + embed_dim)))
    table = jax.random.uniform(k_w, (vocab, embed_dim),
                               dtype=jnp.float32, minval=-bound, maxval=bound)

    # offsets buffer: (0, cumsum(field_dims)[:-1])
    offsets = jnp.asarray(
        np.concatenate([[0], np.cumsum(field_dims)[:-1]]).astype(np.int32))

    # x: (batch, num_fields), field-local indices in [0, field_dims[f])
    u = jax.random.uniform(k_x, (batch, num_fields))
    x = (u * jnp.asarray(field_dims, dtype=jnp.float32)).astype(jnp.int32)

    # f32 path: bit-exact row gather (matches torch module numerics).
    out = jax.block_until_ready(features_embedding(x, offsets, table))
    ref = jnp.take(table, x + offsets[None, :], axis=0)
    assert out.shape == (batch, num_fields, embed_dim)
    np.testing.assert_allclose(np.asarray(out), np.asarray(ref),
                               rtol=1e-6, atol=1e-6)

    # bf16-table path: MXU-native; result is the bf16-rounded embedding row.
    out_bf16 = jax.block_until_ready(
        features_embedding(x, offsets, table, table_dtype=jnp.bfloat16))
    ref_bf16 = jnp.take(table.astype(jnp.bfloat16).astype(jnp.float32),
                        x + offsets[None, :], axis=0)
    np.testing.assert_allclose(np.asarray(out_bf16), np.asarray(ref_bf16),
                               rtol=1e-6, atol=1e-6)

    print("KERNEL_OK")
</pallas_src>

<mosaic_0001>
module attributes {stable_mosaic.version = 11 : i64} {
  func.func @kernel(%arg0: i32, %arg1: memref<8x8xi32, #tpu.memory_space<vmem>>, %arg2: memref<128x32xf32, #tpu.memory_space<vmem>>, %arg3: memref<8x256xf32, #tpu.memory_space<vmem>>) attributes {dimension_semantics = [#tpu.dimension_semantics<parallel>], iteration_bounds = array<i64: 1>, scalar_prefetch = 0 : i64, scratch_operands = 0 : i64, tpu.core_type = #tpu.core_type<tc>, window_params = [{transform_indices = @transform_0, window_bounds = array<i64: 8, 8>}, {pipeline_mode = #tpu.pipeline_mode<synchronous>, transform_indices = @transform_1, window_bounds = array<i64: 128, 32>}, {transform_indices = @transform_2, window_bounds = array<i64: 8, 256>}]} {
    %c0 = arith.constant 0 : index
    %c0_0 = arith.constant 0 : index
    %0 = vector.load %arg1[%c0, %c0_0] : memref<8x8xi32, #tpu.memory_space<vmem>>, vector<8x8xi32>
    %c0_1 = arith.constant 0 : index
    %c0_2 = arith.constant 0 : index
    %1 = vector.load %arg2[%c0_1, %c0_2] : memref<128x32xf32, #tpu.memory_space<vmem>>, vector<128x32xf32>
    %2 = tpu.iota {dimensions = array<i32: 1>} : vector<8x128xi32>
    %3 = vector.extract_strided_slice %0 {offsets = [0, 0], sizes = [8, 1], strides = [1, 1]} : vector<8x8xi32> to vector<8x1xi32>
    %4 = vector.broadcast %3 : vector<8x1xi32> to vector<8x128xi32>
    %5 = arith.cmpi eq, %4, %2 : vector<8x128xi32>
    %6 = arith.extui %5 : vector<8x128xi1> to vector<8x128xi32>
    %7 = arith.sitofp %6 : vector<8x128xi32> to vector<8x128xf32>
    %8 = vector.extract_strided_slice %0 {offsets = [0, 1], sizes = [8, 1], strides = [1, 1]} : vector<8x8xi32> to vector<8x1xi32>
    %9 = vector.broadcast %8 : vector<8x1xi32> to vector<8x128xi32>
    %10 = arith.cmpi eq, %9, %2 : vector<8x128xi32>
    %11 = arith.extui %10 : vector<8x128xi1> to vector<8x128xi32>
    %12 = arith.sitofp %11 : vector<8x128xi32> to vector<8x128xf32>
    %13 = vector.extract_strided_slice %0 {offsets = [0, 2], sizes = [8, 1], strides = [1, 1]} : vector<8x8xi32> to vector<8x1xi32>
    %14 = vector.broadcast %13 : vector<8x1xi32> to vector<8x128xi32>
    %15 = arith.cmpi eq, %14, %2 : vector<8x128xi32>
    %16 = arith.extui %15 : vector<8x128xi1> to vector<8x128xi32>
    %17 = arith.sitofp %16 : vector<8x128xi32> to vector<8x128xf32>
    %18 = vector.extract_strided_slice %0 {offsets = [0, 3], sizes = [8, 1], strides = [1, 1]} : vector<8x8xi32> to vector<8x1xi32>
    %19 = vector.broadcast %18 : vector<8x1xi32> to vector<8x128xi32>
    %20 = arith.cmpi eq, %19, %2 : vector<8x128xi32>
    %21 = arith.extui %20 : vector<8x128xi1> to vector<8x128xi32>
    %22 = arith.sitofp %21 : vector<8x128xi32> to vector<8x128xf32>
    %23 = vector.extract_strided_slice %0 {offsets = [0, 4], sizes = [8, 1], strides = [1, 1]} : vector<8x8xi32> to vector<8x1xi32>
    %24 = vector.broadcast %23 : vector<8x1xi32> to vector<8x128xi32>
    %25 = arith.cmpi eq, %24, %2 : vector<8x128xi32>
    %26 = arith.extui %25 : vector<8x128xi1> to vector<8x128xi32>
    %27 = arith.sitofp %26 : vector<8x128xi32> to vector<8x128xf32>
    %28 = vector.extract_strided_slice %0 {offsets = [0, 5], sizes = [8, 1], strides = [1, 1]} : vector<8x8xi32> to vector<8x1xi32>
    %29 = vector.broadcast %28 : vector<8x1xi32> to vector<8x128xi32>
    %30 = arith.cmpi eq, %29, %2 : vector<8x128xi32>
    %31 = arith.extui %30 : vector<8x128xi1> to vector<8x128xi32>
    %32 = arith.sitofp %31 : vector<8x128xi32> to vector<8x128xf32>
    %33 = vector.extract_strided_slice %0 {offsets = [0, 6], sizes = [8, 1], strides = [1, 1]} : vector<8x8xi32> to vector<8x1xi32>
    %34 = vector.broadcast %33 : vector<8x1xi32> to vector<8x128xi32>
    %35 = arith.cmpi eq, %34, %2 : vector<8x128xi32>
    %36 = arith.extui %35 : vector<8x128xi1> to vector<8x128xi32>
    %37 = arith.sitofp %36 : vector<8x128xi32> to vector<8x128xf32>
    %38 = vector.extract_strided_slice %0 {offsets = [0, 7], sizes = [8, 1], strides = [1, 1]} : vector<8x8xi32> to vector<8x1xi32>
    %39 = vector.broadcast %38 : vector<8x1xi32> to vector<8x128xi32>
    %40 = arith.cmpi eq, %39, %2 : vector<8x128xi32>
    %41 = arith.extui %40 : vector<8x128xi1> to vector<8x128xi32>
    %42 = arith.sitofp %41 : vector<8x128xi32> to vector<8x128xf32>
    %43 = vector.shape_cast %7 : vector<8x128xf32> to vector<1x8x128xf32>
    %44 = vector.shape_cast %12 : vector<8x128xf32> to vector<1x8x128xf32>
    %45 = vector.shape_cast %17 : vector<8x128xf32> to vector<1x8x128xf32>
    %46 = vector.shape_cast %22 : vector<8x128xf32> to vector<1x8x128xf32>
    %47 = vector.shape_cast %27 : vector<8x128xf32> to vector<1x8x128xf32>
    %48 = vector.shape_cast %32 : vector<8x128xf32> to vector<1x8x128xf32>
    %49 = vector.shape_cast %37 : vector<8x128xf32> to vector<1x8x128xf32>
    %50 = vector.shape_cast %42 : vector<8x128xf32> to vector<1x8x128xf32>
    %51 = tpu.concatenate %43, %44, %45, %46, %47, %48, %49, %50 in 0 : vector<1x8x128xf32>, vector<1x8x128xf32>, vector<1x8x128xf32>, vector<1x8x128xf32>, vector<1x8x128xf32>, vector<1x8x128xf32>, vector<1x8x128xf32>, vector<1x8x128xf32> -> vector<8x8x128xf32>
    %52 = vector.shape_cast %51 : vector<8x8x128xf32> to vector<64x128xf32>
    %cst = arith.constant dense<0.000000e+00> : vector<64x32xf32>
    %53 = tpu.matmul %52, %1, %cst {dimension_numbers = #tpu.dot_dimension_numbers<[1], [0], [0], [1], [0, 0, 1, 1], [], []>} : vector<64x128xf32>, vector<128x32xf32>, vector<64x32xf32> -> vector<64x32xf32>
    %54 = vector.shape_cast %53 : vector<64x32xf32> to vector<8x8x32xf32>
    %55 = vector.extract_strided_slice %54 {offsets = [0, 0, 0], sizes = [1, 8, 32], strides = [1, 1, 1]} : vector<8x8x32xf32> to vector<1x8x32xf32>
    %56 = vector.shape_cast %55 : vector<1x8x32xf32> to vector<8x32xf32>
    %57 = vector.extract_strided_slice %54 {offsets = [1, 0, 0], sizes = [1, 8, 32], strides = [1, 1, 1]} : vector<8x8x32xf32> to vector<1x8x32xf32>
    %58 = vector.shape_cast %57 : vector<1x8x32xf32> to vector<8x32xf32>
    %59 = vector.extract_strided_slice %54 {offsets = [2, 0, 0], sizes = [1, 8, 32], strides = [1, 1, 1]} : vector<8x8x32xf32> to vector<1x8x32xf32>
    %60 = vector.shape_cast %59 : vector<1x8x32xf32> to vector<8x32xf32>
    %61 = vector.extract_strided_slice %54 {offsets = [3, 0, 0], sizes = [1, 8, 32], strides = [1, 1, 1]} : vector<8x8x32xf32> to vector<1x8x32xf32>
    %62 = vector.shape_cast %61 : vector<1x8x32xf32> to vector<8x32xf32>
    %63 = vector.extract_strided_slice %54 {offsets = [4, 0, 0], sizes = [1, 8, 32], strides = [1, 1, 1]} : vector<8x8x32xf32> to vector<1x8x32xf32>
    %64 = vector.shape_cast %63 : vector<1x8x32xf32> to vector<8x32xf32>
    %65 = vector.extract_strided_slice %54 {offsets = [5, 0, 0], sizes = [1, 8, 32], strides = [1, 1, 1]} : vector<8x8x32xf32> to vector<1x8x32xf32>
    %66 = vector.shape_cast %65 : vector<1x8x32xf32> to vector<8x32xf32>
    %67 = vector.extract_strided_slice %54 {offsets = [6, 0, 0], sizes = [1, 8, 32], strides = [1, 1, 1]} : vector<8x8x32xf32> to vector<1x8x32xf32>
    %68 = vector.shape_cast %67 : vector<1x8x32xf32> to vector<8x32xf32>
    %69 = vector.extract_strided_slice %54 {offsets = [7, 0, 0], sizes = [1, 8, 32], strides = [1, 1, 1]} : vector<8x8x32xf32> to vector<1x8x32xf32>
    %70 = vector.shape_cast %69 : vector<1x8x32xf32> to vector<8x32xf32>
    %71 = tpu.concatenate %56, %58, %60, %62, %64, %66, %68, %70 in 1 : vector<8x32xf32>, vector<8x32xf32>, vector<8x32xf32>, vector<8x32xf32>, vector<8x32xf32>, vector<8x32xf32>, vector<8x32xf32>, vector<8x32xf32> -> vector<8x256xf32>
    %c0_3 = arith.constant 0 : index
    %c0_4 = arith.constant 0 : index
    %72 = vector.load %arg3[%c0_3, %c0_4] : memref<8x256xf32, #tpu.memory_space<vmem>>, vector<8x256xf32>
    tpu.vector_store %arg3[%c0_3, %c0_4], %71 {strides = array<i32>} : memref<8x256xf32, #tpu.memory_space<vmem>>, vector<8x256xf32>,
    return
  }
  func.func @transform_0(%arg0: i32) -> (i32, i32) {
    %c0_i32 = arith.constant 0 : i32
    %c0_i32_0 = arith.constant 0 : i32
    return %arg0, %c0_i32 : i32, i32
  }
  func.func @transform_1(%arg0: i32) -> (i32, i32) {
    %c0_i32 = arith.constant 0 : i32
    %c0_i32_0 = arith.constant 0 : i32
    %c0_i32_1 = arith.constant 0 : i32
    return %c0_i32, %c0_i32_0 : i32, i32
  }
  func.func @transform_2(%arg0: i32) -> (i32, i32) {
    %c0_i32 = arith.constant 0 : i32
    %c0_i32_0 = arith.constant 0 : i32
    return %arg0, %c0_i32 : i32, i32
  }
}

module attributes {stable_mosaic.version = 11 : i64} {
  func.func @kernel(%arg0: i32, %arg1: memref<8x8xi32, #tpu.memory_space<vmem>>, %arg2: memref<128x32xf32, #tpu.memory_space<vmem>>, %arg3: memref<8x256xf32, #tpu.memory_space<vmem>>) attributes {dimension_semantics = [#tpu.dimension_semantics<parallel>], iteration_bounds = array<i64: 1>, scalar_prefetch = 0 : i64, scratch_operands = 0 : i64, tpu.core_type = #tpu.core_type<tc>, window_params = [{transform_indices = @transform_0, window_bounds = array<i64: 8, 8>}, {pipeline_mode = #tpu.pipeline_mode<synchronous>, transform_indices = @transform_1, window_bounds = array<i64: 128, 32>}, {transform_indices = @transform_2, window_bounds = array<i64: 8, 256>}]} {
    %c0 = arith.constant 0 : index
    %c0_0 = arith.constant 0 : index
    %0 = vector.load %arg1[%c0, %c0_0] : memref<8x8xi32, #tpu.memory_space<vmem>>, vector<8x8xi32>
    %c0_1 = arith.constant 0 : index
    %c0_2 = arith.constant 0 : index
    %1 = vector.load %arg2[%c0_1, %c0_2] : memref<128x32xf32, #tpu.memory_space<vmem>>, vector<128x32xf32>
    %2 = tpu.iota {dimensions = array<i32: 1>} : vector<8x128xi32>
    %3 = vector.extract_strided_slice %0 {offsets = [0, 0], sizes = [8, 1], strides = [1, 1]} : vector<8x8xi32> to vector<8x1xi32>
    %4 = vector.broadcast %3 : vector<8x1xi32> to vector<8x128xi32>
    %5 = arith.cmpi eq, %4, %2 : vector<8x128xi32>
    %6 = arith.extui %5 : vector<8x128xi1> to vector<8x128xi32>
    %7 = arith.sitofp %6 : vector<8x128xi32> to vector<8x128xf32>
    %8 = vector.extract_strided_slice %0 {offsets = [0, 1], sizes = [8, 1], strides = [1, 1]} : vector<8x8xi32> to vector<8x1xi32>
    %9 = vector.broadcast %8 : vector<8x1xi32> to vector<8x128xi32>
    %10 = arith.cmpi eq, %9, %2 : vector<8x128xi32>
    %11 = arith.extui %10 : vector<8x128xi1> to vector<8x128xi32>
    %12 = arith.sitofp %11 : vector<8x128xi32> to vector<8x128xf32>
    %13 = vector.extract_strided_slice %0 {offsets = [0, 2], sizes = [8, 1], strides = [1, 1]} : vector<8x8xi32> to vector<8x1xi32>
    %14 = vector.broadcast %13 : vector<8x1xi32> to vector<8x128xi32>
    %15 = arith.cmpi eq, %14, %2 : vector<8x128xi32>
    %16 = arith.extui %15 : vector<8x128xi1> to vector<8x128xi32>
    %17 = arith.sitofp %16 : vector<8x128xi32> to vector<8x128xf32>
    %18 = vector.extract_strided_slice %0 {offsets = [0, 3], sizes = [8, 1], strides = [1, 1]} : vector<8x8xi32> to vector<8x1xi32>
    %19 = vector.broadcast %18 : vector<8x1xi32> to vector<8x128xi32>
    %20 = arith.cmpi eq, %19, %2 : vector<8x128xi32>
    %21 = arith.extui %20 : vector<8x128xi1> to vector<8x128xi32>
    %22 = arith.sitofp %21 : vector<8x128xi32> to vector<8x128xf32>
    %23 = vector.extract_strided_slice %0 {offsets = [0, 4], sizes = [8, 1], strides = [1, 1]} : vector<8x8xi32> to vector<8x1xi32>
    %24 = vector.broadcast %23 : vector<8x1xi32> to vector<8x128xi32>
    %25 = arith.cmpi eq, %24, %2 : vector<8x128xi32>
    %26 = arith.extui %25 : vector<8x128xi1> to vector<8x128xi32>
    %27 = arith.sitofp %26 : vector<8x128xi32> to vector<8x128xf32>
    %28 = vector.extract_strided_slice %0 {offsets = [0, 5], sizes = [8, 1], strides = [1, 1]} : vector<8x8xi32> to vector<8x1xi32>
    %29 = vector.broadcast %28 : vector<8x1xi32> to vector<8x128xi32>
    %30 = arith.cmpi eq, %29, %2 : vector<8x128xi32>
    %31 = arith.extui %30 : vector<8x128xi1> to vector<8x128xi32>
    %32 = arith.sitofp %31 : vector<8x128xi32> to vector<8x128xf32>
    %33 = vector.extract_strided_slice %0 {offsets = [0, 6], sizes = [8, 1], strides = [1, 1]} : vector<8x8xi32> to vector<8x1xi32>
    %34 = vector.broadcast %33 : vector<8x1xi32> to vector<8x128xi32>
    %35 = arith.cmpi eq, %34, %2 : vector<8x128xi32>
    %36 = arith.extui %35 : vector<8x128xi1> to vector<8x128xi32>
    %37 = arith.sitofp %36 : vector<8x128xi32> to vector<8x128xf32>
    %38 = vector.extract_strided_slice %0 {offsets = [0, 7], sizes = [8, 1], strides = [1, 1]} : vector<8x8xi32> to vector<8x1xi32>
    %39 = vector.broadcast %38 : vector<8x1xi32> to vector<8x128xi32>
    %40 = arith.cmpi eq, %39, %2 : vector<8x128xi32>
    %41 = arith.extui %40 : vector<8x128xi1> to vector<8x128xi32>
    %42 = arith.sitofp %41 : vector<8x128xi32> to vector<8x128xf32>
    %43 = vector.shape_cast %7 : vector<8x128xf32> to vector<1x8x128xf32>
    %44 = vector.shape_cast %12 : vector<8x128xf32> to vector<1x8x128xf32>
    %45 = vector.shape_cast %17 : vector<8x128xf32> to vector<1x8x128xf32>
    %46 = vector.shape_cast %22 : vector<8x128xf32> to vector<1x8x128xf32>
    %47 = vector.shape_cast %27 : vector<8x128xf32> to vector<1x8x128xf32>
    %48 = vector.shape_cast %32 : vector<8x128xf32> to vector<1x8x128xf32>
    %49 = vector.shape_cast %37 : vector<8x128xf32> to vector<1x8x128xf32>
    %50 = vector.shape_cast %42 : vector<8x128xf32> to vector<1x8x128xf32>
    %51 = tpu.concatenate %43, %44, %45, %46, %47, %48, %49, %50 in 0 : vector<1x8x128xf32>, vector<1x8x128xf32>, vector<1x8x128xf32>, vector<1x8x128xf32>, vector<1x8x128xf32>, vector<1x8x128xf32>, vector<1x8x128xf32>, vector<1x8x128xf32> -> vector<8x8x128xf32>
    %52 = vector.shape_cast %51 : vector<8x8x128xf32> to vector<64x128xf32>
    %cst = arith.constant dense<0.000000e+00> : vector<64x32xf32>
    %53 = tpu.matmul %52, %1, %cst {dimension_numbers = #tpu.dot_dimension_numbers<[1], [0], [0], [1], [0, 0, 1, 1], [], []>} : vector<64x128xf32>, vector<128x32xf32>, vector<64x32xf32> -> vector<64x32xf32>
    %54 = vector.shape_cast %53 : vector<64x32xf32> to vector<8x8x32xf32>
    %55 = vector.extract_strided_slice %54 {offsets = [0, 0, 0], sizes = [1, 8, 32], strides = [1, 1, 1]} : vector<8x8x32xf32> to vector<1x8x32xf32>
    %56 = vector.shape_cast %55 : vector<1x8x32xf32> to vector<8x32xf32>
    %57 = vector.extract_strided_slice %54 {offsets = [1, 0, 0], sizes = [1, 8, 32], strides = [1, 1, 1]} : vector<8x8x32xf32> to vector<1x8x32xf32>
    %58 = vector.shape_cast %57 : vector<1x8x32xf32> to vector<8x32xf32>
    %59 = vector.extract_strided_slice %54 {offsets = [2, 0, 0], sizes = [1, 8, 32], strides = [1, 1, 1]} : vector<8x8x32xf32> to vector<1x8x32xf32>
    %60 = vector.shape_cast %59 : vector<1x8x32xf32> to vector<8x32xf32>
    %61 = vector.extract_strided_slice %54 {offsets = [3, 0, 0], sizes = [1, 8, 32], strides = [1, 1, 1]} : vector<8x8x32xf32> to vector<1x8x32xf32>
    %62 = vector.shape_cast %61 : vector<1x8x32xf32> to vector<8x32xf32>
    %63 = vector.extract_strided_slice %54 {offsets = [4, 0, 0], sizes = [1, 8, 32], strides = [1, 1, 1]} : vector<8x8x32xf32> to vector<1x8x32xf32>
    %64 = vector.shape_cast %63 : vector<1x8x32xf32> to vector<8x32xf32>
    %65 = vector.extract_strided_slice %54 {offsets = [5, 0, 0], sizes = [1, 8, 32], strides = [1, 1, 1]} : vector<8x8x32xf32> to vector<1x8x32xf32>
    %66 = vector.shape_cast %65 : vector<1x8x32xf32> to vector<8x32xf32>
    %67 = vector.extract_strided_slice %54 {offsets = [6, 0, 0], sizes = [1, 8, 32], strides = [1, 1, 1]} : vector<8x8x32xf32> to vector<1x8x32xf32>
    %68 = vector.shape_cast %67 : vector<1x8x32xf32> to vector<8x32xf32>
    %69 = vector.extract_strided_slice %54 {offsets = [7, 0, 0], sizes = [1, 8, 32], strides = [1, 1, 1]} : vector<8x8x32xf32> to vector<1x8x32xf32>
    %70 = vector.shape_cast %69 : vector<1x8x32xf32> to vector<8x32xf32>
    %71 = tpu.concatenate %56, %58, %60, %62, %64, %66, %68, %70 in 1 : vector<8x32xf32>, vector<8x32xf32>, vector<8x32xf32>, vector<8x32xf32>, vector<8x32xf32>, vector<8x32xf32>, vector<8x32xf32>, vector<8x32xf32> -> vector<8x256xf32>
    %c0_3 = arith.constant 0 : index
    %c0_4 = arith.constant 0 : index
    %72 = vector.load %arg3[%c0_3, %c0_4] : memref<8x256xf32, #tpu.memory_space<vmem>>, vector<8x256xf32>
    tpu.vector_store %arg3[%c0_3, %c0_4], %71 {strides = array<i32>} : memref<8x256xf32, #tpu.memory_space<vmem>>, vector<8x256xf32>,
    return
  }
  func.func @transform_0(%arg0: i32) -> (i32, i32) {
    %c0_i32 = arith.constant 0 : i32
    %c0_i32_0 = arith.constant 0 : i32
    return %arg0, %c0_i32 : i32, i32
  }
  func.func @transform_1(%arg0: i32) -> (i32, i32) {
    %c0_i32 = arith.constant 0 : i32
    %c0_i32_0 = arith.constant 0 : i32
    %c0_i32_1 = arith.constant 0 : i32
    return %c0_i32, %c0_i32_0 : i32, i32
  }
  func.func @transform_2(%arg0: i32) -> (i32, i32) {
    %c0_i32 = arith.constant 0 : i32
    %c0_i32_0 = arith.constant 0 : i32
    return %arg0, %c0_i32 : i32, i32
  }
}

</mosaic_0001>

<bundles_post_ra>
// kernel: tpu_custom_call.1
= control target key start
LH: loop header
LB: loop body
LE: loop exit
PB: predicated region body
PF: predicated region fallthrough
CT: control target
= control target key end

     0   :  { %v411_v2 = vmov 1   ;;  %v412_v3 = vmov 0   ;;  %v413_v11 = vmov 5   ;;  %v414_v12 = vmov 4   ;;  %s512_s0 = inlined_call_operand.vmem [shape: s32[8,8], index: 0, kind: input, shape index: {}]   ;;  %s513_s1 = inlined_call_operand.vmem [shape: f32[128,32], index: 1, kind: input, shape index: {}]   ;;  %s514_s2 = inlined_call_operand.hbm [shape: f32[8,256], index: 2, kind: output, shape index: {}]  }
   0x1   :  { %v442_v0 = vld [vmem:[%s512_s0] sm:$0xff]  ;;  %380 = vset.pattern.permute.xlu1 %v411_v2  ;;  %378 = vset.pattern.permute.xlu0 %v412_v3  ;;  %v14_v4 = vld [vmem:[%s513_s1 + $0x8] sm:$0xff]  ;;  %v15_v5 = vld [vmem:[%s513_s1 + $0x10] sm:$0xff] }
   0x2   :  { %v13_v1 = vld [vmem:[%s513_s1] sm:$0xff]  ;;  %38 = vperm.xlu1 %380, %v442_v0   ;;  %32 = vperm.xlu0 %378, %v442_v0   ;;  %v16_v7 = vld [vmem:[%s513_s1 + $0x18] sm:$0xff]  ;;  %v18_v9 = vld [vmem:[%s513_s1 + $0x28] sm:$0xff] }
   0x3   :  { %v317_v6 = vpack.c.bf16 %v14_v4, %v13_v1  ;;  %v17_v8 = vld [vmem:[%s513_s1 + $0x20] sm:$0xff]  ;;  %v321_v10 = vpack.c.bf16 %v16_v7, %v15_v5 }
   0x4   :  { %v325_v13 = vpack.c.bf16 %v18_v9, %v17_v8 }
   0x5   :  { %318 = vmatprep.subr.bf16.mxu0 %v317_v6  ;;  %349 = vmatprep.subr.bf16.mxu1 %v317_v6 }
   0x6   :  { %320 = vmatpush3.bf16.msra.mxu0 %v317_v6  ;;  %357 = vmatpush3.bf16.msra.mxu1 %v317_v6 }
   0x7   :  { %381 = vset.pattern.permute.xlu1 %v413_v11  ;;  %379 = vset.pattern.permute.xlu0 %v414_v12 }
   0x8   :  { %7 = vsyncpa [#allocation3], 0  ;;  %62 = vperm.xlu1 %381, %v442_v0   ;;  %56 = vperm.xlu0 %379, %v442_v0   ;;  %v19_v14 = vld [vmem:[%s513_s1 + $0x30] sm:$0xff]  ;;  %v20_v15 = vld [vmem:[%s513_s1 + $0x38] sm:$0xff]  ;;  %v415_v17 = vmov 2   ;;  %v416_v18 = vmov 6   ;;  %v29_v33 = vlaneseq }
   0x9   :  { %322 = vmatprep.subr.bf16.mxu0 %v321_v10  ;;  %350 = vmatprep.subr.bf16.mxu1 %v321_v10  ;;  %v329_v16 = vpack.c.bf16 %v20_v15, %v19_v14  ;;  %v21_v19 = vld [vmem:[%s513_s1 + $0x40] sm:$0xff]  ;;  %v22_v20 = vld [vmem:[%s513_s1 + $0x48] sm:$0xff]  ;;  %v23_v22 = vld [vmem:[%s513_s1 + $0x50] sm:$0xff]  ;;  %v417_v24 = vmov 3   ;;  %v418_v25 = vmov 7   ;;  %v419_v37 = vmov 1.0  }
   0xa   :  { %324 = vmatpush3.bf16.msra.mxu0 %v321_v10  ;;  %358 = vmatpush3.bf16.msra.mxu1 %v321_v10  ;;  %v333_v21 = vpack.c.bf16 %v22_v20, %v21_v19  ;;  %v24_v23 = vld [vmem:[%s513_s1 + $0x58] sm:$0xff]  ;;  %v25_v27 = vld [vmem:[%s513_s1 + $0x60] sm:$0xff]  ;;  %v26_v28 = vld [vmem:[%s513_s1 + $0x68] sm:$0xff]  ;;  %v30_v34 = vand.u32 127, %v29_v33  ;;  %s421_s14 = smov 64   ;;  %s422_s15 = smov 96  }
   0xb   :  { %326 = vmatprep.subr.bf16.mxu0 %v325_v13  ;;  %351 = vmatprep.subr.bf16.mxu1 %v325_v13  ;;  %v337_v26 = vpack.c.bf16 %v24_v23, %v23_v22  ;;  %v341_v29 = vpack.c.bf16 %v26_v28, %v25_v27  ;;  %v27_v30 = vld [vmem:[%s513_s1 + $0x70] sm:$0xff]  ;;  %v28_v31 = vld [vmem:[%s513_s1 + $0x78] sm:$0xff]  ;;  %s420_s1 = smov 32   ;;  %vm208_vm8 = vcmask 261120   ;;  %vm210_vm9 = vcmask 523264   ;;  %s423_s16 = smov [#allocation2]  }
   0xc   :  { %382 = vset.pattern.permute.xlu1 %v415_v17  ;;  %383 = vset.pattern.permute.xlu0 %v416_v18  ;;  %v345_v32 = vpack.c.bf16 %v28_v31, %v27_v30  ;;  %vm212_vm10 = vcmask 785408   ;;  %s225_s0 = sshll.u32 %s423_s16, 4  ;;  %s226_s0 = int_to_ptr.vmem [resolvable:$true] %s225_s0 }
   0xd   :  { %44 = vperm.xlu1 %382, %v442_v0   ;;  %68 = vperm.xlu0 %383, %v442_v0   ;;  %s387_s17 = scalar_lea.vmem %s226_s0, 256  ;;  %p392_p1 = scmp.lt.s32.totalorder %s226_s0, %s226_s0 }
   0xe   :  { %328 = vmatpush3.bf16.msra.mxu0 %v325_v13  ;;  %359 = vmatpush3.bf16.msra.mxu1 %v325_v13  ;;  %p388_p0 = scmp.ne.s32.totalorder %s226_s0, %s387_s17  ;;  %p393_p2 = scmp.lt.s32.totalorder %s387_s17, %s387_s17 }
   0xf   :  { %330 = vmatprep.subr.bf16.mxu0 %v329_v16  ;;  %352 = vmatprep.subr.bf16.mxu1 %v329_v16 }
  0x10   :  { %p394_p3 = por %p393_p2, %p392_p1 }
  0x11   :  { %384 = vset.pattern.permute.xlu1 %v417_v24  ;;  %386 = vset.pattern.permute.xlu0 %v418_v25 }
  0x12   :  { %50 = vperm.xlu1 %384, %v442_v0   ;;  %332 = vmatpush3.bf16.msra.mxu0 %v329_v16  ;;  %p395_p4 = pnand %p394_p3, %p388_p0 }
  0x13   :  { %334 = vmatprep.subr.bf16.mxu0 %v333_v21  ;;  %360 = vmatpush3.bf16.msra.mxu1 %v329_v16 }
  0x14   :  { %353 = vmatprep.subr.bf16.mxu1 %v333_v21 }
  0x16   :  { %385 = vset.pattern.permute.xlu1 %v418_v25  ;;  %336 = vmatpush3.bf16.msra.mxu0 %v333_v21 }
  0x17   :  { %74 = vperm.xlu1 %385, %v442_v0   ;;  %338 = vmatprep.subr.bf16.mxu0 %v337_v26 }
  0x18   :  { %361 = vmatpush3.bf16.msra.mxu1 %v333_v21 }
  0x19   :  { %354 = vmatprep.subr.bf16.mxu1 %v337_v26 }
  0x1a   :  { %340 = vmatpush3.bf16.msra.mxu0 %v337_v26 }
  0x1b   :  { %342 = vmatprep.subr.bf16.mxu0 %v341_v29 }
  0x1c   :  { %362 = vmatpush3.bf16.msra.mxu1 %v337_v26 }
  0x1d   :  { %355 = vmatprep.subr.bf16.mxu1 %v341_v29 }
  0x1e   :  { %344 = vmatpush3.bf16.msra.mxu0 %v341_v29 }
  0x1f   :  { %346 = vmatprep.subr.bf16.mxu0 %v345_v32 }
  0x20   :  { %363 = vmatpush3.bf16.msra.mxu1 %v341_v29 }
  0x21   :  { %356 = vmatprep.subr.bf16.mxu1 %v345_v32 }
  0x22   :  { %348 = vmatpush3.bf16.msra.mxu0 %v345_v32 }
  0x24   :  { %364 = vmatpush3.bf16.msra.mxu1 %v345_v32 }
  0x81   :  { %v39_v35 = vpop.permute.xlu1 %38  ;;  %v33_v36 = vpop.permute.xlu0 %32 }
  0x82   :  { %vm40_vm0 = vcmp.eq.s32.totalorder %v39_v35, %v30_v34  ;;  %vm34_vm1 = vcmp.eq.s32.totalorder %v33_v36, %v30_v34 }
  0x83   :  { %305 = vmatprep.mubr.msk.f32.mxu0 %vm34_vm1, %v419_v37 }
  0x84   :  { %306 = vmatmul.mubr.msk.f32.vlgmr.msra.gmra.mrb[0].mxu0 %vm40_vm0, %v419_v37 }
  0x87   :  { %v63_v38 = vpop.permute.xlu1 %62  ;;  %v57_v39 = vpop.permute.xlu0 %56 }
  0x88   :  { %vm64_vm2 = vcmp.eq.s32.totalorder %v63_v38, %v30_v34  ;;  %vm58_vm3 = vcmp.eq.s32.totalorder %v57_v39, %v30_v34 }
  0x89   :  { %311 = vmatprep.mubr.msk.f32.mxu1 %vm58_vm3, %v419_v37 }
  0x8a   :  { %312 = vmatmul.mubr.msk.f32.vlgmr.msra.gmra.mrb[0].mxu1 %vm64_vm2, %v419_v37 }
  0x8c   :  { %v45_v40 = vpop.permute.xlu1 %44  ;;  %v69_v41 = vpop.permute.xlu0 %68 }
  0x8d   :  { %vm46_vm4 = vcmp.eq.s32.totalorder %v45_v40, %v30_v34  ;;  %vm70_vm5 = vcmp.eq.s32.totalorder %v69_v41, %v30_v34 }
  0x8e   :  { %308 = vmatprep.mubr.msk.f32.mxu0 %vm46_vm4, %v419_v37  ;;  %314 = vmatprep.mubr.msk.f32.mxu1 %vm70_vm5, %v419_v37 }
  0x91   :  { %v51_v42 = vpop.permute.xlu1 %50 }
  0x92   :  { %vm52_vm6 = vcmp.eq.s32.totalorder %v51_v42, %v30_v34 }
  0x93   :  { %309 = vmatmul.mubr.msk.f32.gmra.mrb[2].mxu0 %vm52_vm6, %v419_v37 }
  0x96   :  { %v75_v43 = vpop.permute.xlu1 %74 }
  0x97   :  { %vm76_vm7 = vcmp.eq.s32.totalorder %v75_v43, %v30_v34 }
  0x98   :  { %315 = vmatmul.mubr.msk.f32.gmra.mrb[2].mxu1 %vm76_vm7, %v419_v37 }
 0x157   :  { %v307_v44 = vpop.f32.mrb[0].mxu0 }
 0x158   :  { %185 = vrot.lane.b32.xlu0 %v307_v44, %s420_s1  ;;  %v145_v45 = vpop.f32.mrb[1].mxu0 }
 0x15d   :  { %v313_v46 = vpop.f32.mrb[0].mxu1 }
 0x15e   :  { %197 = vrot.lane.b32.xlu1 %v313_v46, %s420_s1  ;;  %v165_v47 = vpop.f32.mrb[1].mxu1 }
 0x166   :  { %v310_v48 = vpop.f32.mrb[2].mxu0 }
 0x167   :  { %v155_v49 = vpop.f32.mrb[3].mxu0 }
 0x168   :  { %189 = vrot.lane.b32.xlu0 %v155_v49, %s421_s14 }
 0x16b   :  { %v316_v50 = vpop.f32.mrb[2].mxu1 }
 0x16c   :  { %193 = vrot.lane.b32.xlu0 %v310_v48, %s422_s15  ;;  %v175_v51 = vpop.f32.mrb[3].mxu1 }
 0x16d   :  { %201 = vrot.lane.b32.xlu1 %v175_v51, %s421_s14 }
 0x171   :  { %205 = vrot.lane.b32.xlu1 %v316_v50, %s422_s15 }
 0x1ca   :  { %v186_v52 = vpop.permute.xlu0 %185 }
 0x1cb   :  { %v209_v55 = vsel %vm208_vm8, %v145_v45, %v186_v52 }
 0x1d0   :  { %v198_v54 = vpop.permute.xlu1 %197 }
 0x1d1   :  { %v214_v60 = vsel %vm208_vm8, %v165_v47, %v198_v54 }
 0x1da   :  { %v190_v53 = vpop.permute.xlu0 %189 }
 0x1db   :  { %v211_v56 = vsel %vm210_vm9, %v209_v55, %v190_v53 }
 0x1de   :  { %v194_v57 = vpop.permute.xlu0 %193 }
 0x1df   :  { %v213_v58 = vsel %vm212_vm10, %v211_v56, %v194_v57  ;;  %v202_v59 = vpop.permute.xlu1 %201 }
 0x1e0   :  { %217 = vst [vmem:[#allocation2] sm:$0xff] %v213_v58  ;;  %v215_v61 = vsel %vm210_vm9, %v214_v60, %v202_v59 }
 0x1e3   :  { %v206_v62 = vpop.permute.xlu1 %205 }
 0x1e4   :  { %v216_v63 = vsel %vm212_vm10, %v215_v61, %v206_v62 }
 0x1e5   :  { %218 = vst [vmem:[#allocation2 + $0x8] sm:$0xff] %v216_v63 }
 0x1e6   :  { %398 = shalt.err (!%p395_p4)
}
 0x1e7   :  { %s399_s20 = scalar_lea.hbm %s514_s2, 256 }
 0x1e8   :  { %p400_p5 = scmp.ne.s32.totalorder %s514_s2, %s399_s20  ;;  %p403_p6 = scmp.lt.u32.totalorder %s399_s20, %s514_s2 }
 0x1ea   :  { %p405_p7 = pnand %p403_p6, %p400_p5 }
 0x1ec   :  { %408 = shalt.err (!%p405_p7)
}
 0x1ed   :  { %228 = dma.vmem_to_hbm [thread:$0]  %s226_s0, 256, %s514_s2, [#allocation3]  }
 0x1ee   :  { %409 = dma.done.wait [#allocation3], 256  }
 0x1ef   :  { %410 = vsyncadd [#allocation3], 4294967040 }
 0x1f0   :  { %232 = vsyncpa [#allocation3], 1 }

// kernel: tpu_custom_call.1
= control target key start
LH: loop header
LB: loop body
LE: loop exit
PB: predicated region body
PF: predicated region fallthrough
CT: control target
= control target key end

     0   :  { %v411_v2 = vmov 1   ;;  %v412_v3 = vmov 0   ;;  %v413_v11 = vmov 5   ;;  %v414_v12 = vmov 4   ;;  %s512_s0 = inlined_call_operand.vmem [shape: s32[8,8], index: 0, kind: input, shape index: {}]   ;;  %s513_s1 = inlined_call_operand.vmem [shape: f32[128,32], index: 1, kind: input, shape index: {}]   ;;  %s514_s2 = inlined_call_operand.hbm [shape: f32[8,256], index: 2, kind: output, shape index: {}]  }
   0x1   :  { %v442_v0 = vld [vmem:[%s512_s0] sm:$0xff]  ;;  %380 = vset.pattern.permute.xlu1 %v411_v2  ;;  %378 = vset.pattern.permute.xlu0 %v412_v3  ;;  %v14_v4 = vld [vmem:[%s513_s1 + $0x8] sm:$0xff]  ;;  %v15_v5 = vld [vmem:[%s513_s1 + $0x10] sm:$0xff] }
   0x2   :  { %v13_v1 = vld [vmem:[%s513_s1] sm:$0xff]  ;;  %38 = vperm.xlu1 %380, %v442_v0   ;;  %32 = vperm.xlu0 %378, %v442_v0   ;;  %v16_v7 = vld [vmem:[%s513_s1 + $0x18] sm:$0xff]  ;;  %v18_v9 = vld [vmem:[%s513_s1 + $0x28] sm:$0xff] }
   0x3   :  { %v317_v6 = vpack.c.bf16 %v14_v4, %v13_v1  ;;  %v17_v8 = vld [vmem:[%s513_s1 + $0x20] sm:$0xff]  ;;  %v321_v10 = vpack.c.bf16 %v16_v7, %v15_v5 }
   0x4   :  { %v325_v13 = vpack.c.bf16 %v18_v9, %v17_v8 }
   0x5   :  { %318 = vmatprep.subr.bf16.mxu0 %v317_v6  ;;  %349 = vmatprep.subr.bf16.mxu1 %v317_v6 }
   0x6   :  { %320 = vmatpush3.bf16.msra.mxu0 %v317_v6  ;;  %357 = vmatpush3.bf16.msra.mxu1 %v317_v6 }
   0x7   :  { %381 = vset.pattern.permute.xlu1 %v413_v11  ;;  %379 = vset.pattern.permute.xlu0 %v414_v12 }
   0x8   :  { %7 = vsyncpa [#allocation3], 0  ;;  %62 = vperm.xlu1 %381, %v442_v0   ;;  %56 = vperm.xlu0 %379, %v442_v0   ;;  %v19_v14 = vld [vmem:[%s513_s1 + $0x30] sm:$0xff]  ;;  %v20_v15 = vld [vmem:[%s513_s1 + $0x38] sm:$0xff]  ;;  %v415_v17 = vmov 2   ;;  %v416_v18 = vmov 6   ;;  %v29_v33 = vlaneseq }
   0x9   :  { %322 = vmatprep.subr.bf16.mxu0 %v321_v10  ;;  %350 = vmatprep.subr.bf16.mxu1 %v321_v10  ;;  %v329_v16 = vpack.c.bf16 %v20_v15, %v19_v14  ;;  %v21_v19 = vld [vmem:[%s513_s1 + $0x40] sm:$0xff]  ;;  %v22_v20 = vld [vmem:[%s513_s1 + $0x48] sm:$0xff]  ;;  %v23_v22 = vld [vmem:[%s513_s1 + $0x50] sm:$0xff]  ;;  %v417_v24 = vmov 3   ;;  %v418_v25 = vmov 7   ;;  %v419_v37 = vmov 1.0  }
   0xa   :  { %324 = vmatpush3.bf16.msra.mxu0 %v321_v10  ;;  %358 = vmatpush3.bf16.msra.mxu1 %v321_v10  ;;  %v333_v21 = vpack.c.bf16 %v22_v20, %v21_v19  ;;  %v24_v23 = vld [vmem:[%s513_s1 + $0x58] sm:$0xff]  ;;  %v25_v27 = vld [vmem:[%s513_s1 + $0x60] sm:$0xff]  ;;  %v26_v28 = vld [vmem:[%s513_s1 + $0x68] sm:$0xff]  ;;  %v30_v34 = vand.u32 127, %v29_v33  ;;  %s421_s14 = smov 64   ;;  %s422_s15 = smov 96  }
   0xb   :  { %326 = vmatprep.subr.bf16.mxu0 %v325_v13  ;;  %351 = vmatprep.subr.bf16.mxu1 %v325_v13  ;;  %v337_v26 = vpack.c.bf16 %v24_v23, %v23_v22  ;;  %v341_v29 = vpack.c.bf16 %v26_v28, %v25_v27  ;;  %v27_v30 = vld [vmem:[%s513_s1 + $0x70] sm:$0xff]  ;;  %v28_v31 = vld [vmem:[%s513_s1 + $0x78] sm:$0xff]  ;;  %s420_s1 = smov 32   ;;  %vm208_vm8 = vcmask 261120   ;;  %vm210_vm9 = vcmask 523264   ;;  %s423_s16 = smov [#allocation2]  }
   0xc   :  { %382 = vset.pattern.permute.xlu1 %v415_v17  ;;  %383 = vset.pattern.permute.xlu0 %v416_v18  ;;  %v345_v32 = vpack.c.bf16 %v28_v31, %v27_v30  ;;  %vm212_vm10 = vcmask 785408   ;;  %s225_s0 = sshll.u32 %s423_s16, 4  ;;  %s226_s0 = int_to_ptr.vmem [resolvable:$true] %s225_s0 }
   0xd   :  { %44 = vperm.xlu1 %382, %v442_v0   ;;  %68 = vperm.xlu0 %383, %v442_v0   ;;  %s387_s17 = scalar_lea.vmem %s226_s0, 256  ;;  %p392_p1 = scmp.lt.s32.totalorder %s226_s0, %s226_s0 }
   0xe   :  { %328 = vmatpush3.bf16.msra.mxu0 %v325_v13  ;;  %359 = vmatpush3.bf16.msra.mxu1 %v325_v13  ;;  %p388_p0 = scmp.ne.s32.totalorder %s226_s0, %s387_s17  ;;  %p393_p2 = scmp.lt.s32.totalorder %s387_s17, %s387_s17 }
   0xf   :  { %330 = vmatprep.subr.bf16.mxu0 %v329_v16  ;;  %352 = vmatprep.subr.bf16.mxu1 %v329_v16 }
  0x10   :  { %p394_p3 = por %p393_p2, %p392_p1 }
  0x11   :  { %384 = vset.pattern.permute.xlu1 %v417_v24  ;;  %386 = vset.pattern.permute.xlu0 %v418_v25 }
  0x12   :  { %50 = vperm.xlu1 %384, %v442_v0   ;;  %332 = vmatpush3.bf16.msra.mxu0 %v329_v16  ;;  %p395_p4 = pnand %p394_p3, %p388_p0 }
  0x13   :  { %334 = vmatprep.subr.bf16.mxu0 %v333_v21  ;;  %360 = vmatpush3.bf16.msra.mxu1 %v329_v16 }
  0x14   :  { %353 = vmatprep.subr.bf16.mxu1 %v333_v21 }
  0x16   :  { %385 = vset.pattern.permute.xlu1 %v418_v25  ;;  %336 = vmatpush3.bf16.msra.mxu0 %v333_v21 }
  0x17   :  { %74 = vperm.xlu1 %385, %v442_v0   ;;  %338 = vmatprep.subr.bf16.mxu0 %v337_v26 }
  0x18   :  { %361 = vmatpush3.bf16.msra.mxu1 %v333_v21 }
  0x19   :  { %354 = vmatprep.subr.bf16.mxu1 %v337_v26 }
  0x1a   :  { %340 = vmatpush3.bf16.msra.mxu0 %v337_v26 }
  0x1b   :  { %342 = vmatprep.subr.bf16.mxu0 %v341_v29 }
  0x1c   :  { %362 = vmatpush3.bf16.msra.mxu1 %v337_v26 }
  0x1d   :  { %355 = vmatprep.subr.bf16.mxu1 %v341_v29 }
  0x1e   :  { %344 = vmatpush3.bf16.msra.mxu0 %v341_v29 }
  0x1f   :  { %346 = vmatprep.subr.bf16.mxu0 %v345_v32 }
  0x20   :  { %363 = vmatpush3.bf16.msra.mxu1 %v341_v29 }
  0x21   :  { %356 = vmatprep.subr.bf16.mxu1 %v345_v32 }
  0x22   :  { %348 = vmatpush3.bf16.msra.mxu0 %v345_v32 }
  0x24   :  { %364 = vmatpush3.bf16.msra.mxu1 %v345_v32 }
  0x81   :  { %v39_v35 = vpop.permute.xlu1 %38  ;;  %v33_v36 = vpop.permute.xlu0 %32 }
  0x82   :  { %vm40_vm0 = vcmp.eq.s32.totalorder %v39_v35, %v30_v34  ;;  %vm34_vm1 = vcmp.eq.s32.totalorder %v33_v36, %v30_v34 }
  0x83   :  { %305 = vmatprep.mubr.msk.f32.mxu0 %vm34_vm1, %v419_v37 }
  0x84   :  { %306 = vmatmul.mubr.msk.f32.vlgmr.msra.gmra.mrb[0].mxu0 %vm40_vm0, %v419_v37 }
  0x87   :  { %v63_v38 = vpop.permute.xlu1 %62  ;;  %v57_v39 = vpop.permute.xlu0 %56 }
  0x88   :  { %vm64_vm2 = vcmp.eq.s32.totalorder %v63_v38, %v30_v34  ;;  %vm58_vm3 = vcmp.eq.s32.totalorder %v57_v39, %v30_v34 }
  0x89   :  { %311 = vmatprep.mubr.msk.f32.mxu1 %vm58_vm3, %v419_v37 }
  0x8a   :  { %312 = vmatmul.mubr.msk.f32.vlgmr.msra.gmra.mrb[0].mxu1 %vm64_vm2, %v419_v37 }
  0x8c   :  { %v45_v40 = vpop.permute.xlu1 %44  ;;  %v69_v41 = vpop.permute.xlu0 %68 }
  0x8d   :  { %vm46_vm4 = vcmp.eq.s32.totalorder %v45_v40, %v30_v34  ;;  %vm70_vm5 = vcmp.eq.s32.totalorder %v69_v41, %v30_v34 }
  0x8e   :  { %308 = vmatprep.mubr.msk.f32.mxu0 %vm46_vm4, %v419_v37  ;;  %314 = vmatprep.mubr.msk.f32.mxu1 %vm70_vm5, %v419_v37 }
  0x91   :  { %v51_v42 = vpop.permute.xlu1 %50 }
  0x92   :  { %vm52_vm6 = vcmp.eq.s32.totalorder %v51_v42, %v30_v34 }
  0x93   :  { %309 = vmatmul.mubr.msk.f32.gmra.mrb[2].mxu0 %vm52_vm6, %v419_v37 }
  0x96   :  { %v75_v43 = vpop.permute.xlu1 %74 }
  0x97   :  { %vm76_vm7 = vcmp.eq.s32.totalorder %v75_v43, %v30_v34 }
  0x98   :  { %315 = vmatmul.mubr.msk.f32.gmra.mrb[2].mxu1 %vm76_vm7, %v419_v37 }
 0x157   :  { %v307_v44 = vpop.f32.mrb[0].mxu0 }
 0x158   :  { %185 = vrot.lane.b32.xlu0 %v307_v44, %s420_s1  ;;  %v145_v45 = vpop.f32.mrb[1].mxu0 }
 0x15d   :  { %v313_v46 = vpop.f32.mrb[0].mxu1 }
 0x15e   :  { %197 = vrot.lane.b32.xlu1 %v313_v46, %s420_s1  ;;  %v165_v47 = vpop.f32.mrb[1].mxu1 }
 0x166   :  { %v310_v48 = vpop.f32.mrb[2].mxu0 }
 0x167   :  { %v155_v49 = vpop.f32.mrb[3].mxu0 }
 0x168   :  { %189 = vrot.lane.b32.xlu0 %v155_v49, %s421_s14 }
 0x16b   :  { %v316_v50 = vpop.f32.mrb[2].mxu1 }
 0x16c   :  { %193 = vrot.lane.b32.xlu0 %v310_v48, %s422_s15  ;;  %v175_v51 = vpop.f32.mrb[3].mxu1 }
 0x16d   :  { %201 = vrot.lane.b32.xlu1 %v175_v51, %s421_s14 }
 0x171   :  { %205 = vrot.lane.b32.xlu1 %v316_v50, %s422_s15 }
 0x1ca   :  { %v186_v52 = vpop.permute.xlu0 %185 }
 0x1cb   :  { %v209_v55 = vsel %vm208_vm8, %v145_v45, %v186_v52 }
 0x1d0   :  { %v198_v54 = vpop.permute.xlu1 %197 }
 0x1d1   :  { %v214_v60 = vsel %vm208_vm8, %v165_v47, %v198_v54 }
 0x1da   :  { %v190_v53 = vpop.permute.xlu0 %189 }
 0x1db   :  { %v211_v56 = vsel %vm210_vm9, %v209_v55, %v190_v53 }
 0x1de   :  { %v194_v57 = vpop.permute.xlu0 %193 }
 0x1df   :  { %v213_v58 = vsel %vm212_vm10, %v211_v56, %v194_v57  ;;  %v202_v59 = vpop.permute.xlu1 %201 }
 0x1e0   :  { %217 = vst [vmem:[#allocation2] sm:$0xff] %v213_v58  ;;  %v215_v61 = vsel %vm210_vm9, %v214_v60, %v202_v59 }
 0x1e3   :  { %v206_v62 = vpop.permute.xlu1 %205 }
 0x1e4   :  { %v216_v63 = vsel %vm212_vm10, %v215_v61, %v206_v62 }
 0x1e5   :  { %218 = vst [vmem:[#allocation2 + $0x8] sm:$0xff] %v216_v63 }
 0x1e6   :  { %398 = shalt.err (!%p395_p4)
}
 0x1e7   :  { %s399_s20 = scalar_lea.hbm %s514_s2, 256 }
 0x1e8   :  { %p400_p5 = scmp.ne.s32.totalorder %s514_s2, %s399_s20  ;;  %p403_p6 = scmp.lt.u32.totalorder %s399_s20, %s514_s2 }
 0x1ea   :  { %p405_p7 = pnand %p403_p6, %p400_p5 }
 0x1ec   :  { %408 = shalt.err (!%p405_p7)
}
 0x1ed   :  { %228 = dma.vmem_to_hbm [thread:$0]  %s226_s0, 256, %s514_s2, [#allocation3]  }
 0x1ee   :  { %409 = dma.done.wait [#allocation3], 256  }
 0x1ef   :  { %410 = vsyncadd [#allocation3], 4294967040 }
 0x1f0   :  { %232 = vsyncpa [#allocation3], 1 }

</bundles_post_ra>
